<compile_context>
chip_gen: v7x
topology: tpu7x:2x2x1
jax: 0.10.0
libtpu: 0.0.40
codegen_flags: <defaults>
</compile_context>

<pallas_src>
import jax
import jax.numpy as jnp
from jax.experimental import pallas as pl
from jax.experimental.pallas import tpu as pltpu

SMOOTH = 1.0
LANE = 128          # vreg lane width (last dim)
BLOCK_ROWS = 2048   # rows per block in the tiled path (1 MiB f32 per input block)


def _dice_kernel(yp_ref, yt_ref, out_ref, acc_ref):
    i = pl.program_id(0)

    @pl.when(i == 0)
    def _():
        acc_ref[...] = jnp.zeros_like(acc_ref)

    yp = yp_ref[...].astype(jnp.float32)
    yt = yt_ref[...].astype(jnp.float32)

    # Lane-resident partial sums: reduce only along the sublane axis per step.
    # Row 0: intersection partials, row 1: fused (y_pred + y_true) partials.
    acc_ref[0:1, :] += jnp.sum(yp * yt, axis=0, keepdims=True)
    acc_ref[1:2, :] += jnp.sum(yp + yt, axis=0, keepdims=True)

    @pl.when(i == pl.num_programs(0) - 1)
    def _():
        inter = jnp.sum(acc_ref[0:1, :])   # single cross-lane reduce
        denom = jnp.sum(acc_ref[1:2, :])
        dsc = (2.0 * inter + SMOOTH) / (denom + SMOOTH)
        out_ref[0, 0] = 1.0 - dsc


def dice_loss(y_pred, y_true):
    assert y_pred.shape == y_true.shape, "y_pred and y_true must match"
    yp = y_pred.reshape(-1)
    yt = y_true.reshape(-1)
    n = yp.shape[0]

    # Pad only the sub-128 tail so the last dim is lane-dense (zeros are inert).
    n128 = ((n + LANE - 1) // LANE) * LANE
    if n128 != n:
        yp = jnp.pad(yp, (0, n128 - n))
        yt = jnp.pad(yt, (0, n128 - n))
    rows = n128 // LANE

    if rows <= BLOCK_ROWS:
        # Single block covering the full array — grid of 1, no pipeline overhead.
        br = rows
    else:
        # Tiled path: pad rows to a multiple of BLOCK_ROWS (zero rows are inert).
        br = BLOCK_ROWS
        rows_pad = ((rows + br - 1) // br) * br
        if rows_pad != rows:
            extra = (rows_pad - rows) * LANE
            yp = jnp.pad(yp, (0, extra))
            yt = jnp.pad(yt, (0, extra))
            rows = rows_pad

    yp2 = yp.reshape(rows, LANE)
    yt2 = yt.reshape(rows, LANE)
    grid = (rows // br,)

    out = pl.pallas_call(
        _dice_kernel,
        out_shape=jax.ShapeDtypeStruct((1, 1), jnp.float32),
        grid_spec=pltpu.PrefetchScalarGridSpec(
            num_scalar_prefetch=0,
            grid=grid,
            in_specs=[
                pl.BlockSpec((br, LANE), lambda i: (i, 0)),
                pl.BlockSpec((br, LANE), lambda i: (i, 0)),
            ],
            out_specs=pl.BlockSpec(memory_space=pltpu.SMEM),
            scratch_shapes=[pltpu.VMEM((2, LANE), jnp.float32)],
        ),
        compiler_params=pltpu.CompilerParams(
            dimension_semantics=("arbitrary",)  # sequential reduction axis
        ),
    )(yp2, yt2)
    return out[0, 0]


def _dice_loss_ref(y_pred, y_true):
    yp = y_pred.reshape(-1).astype(jnp.float32)
    yt = y_true.reshape(-1).astype(jnp.float32)
    inter = jnp.sum(yp * yt)
    dsc = (2.0 * inter + SMOOTH) / (jnp.sum(yp) + jnp.sum(yt) + SMOOTH)
    return 1.0 - dsc


if __name__ == "__main__":
    key = jax.random.PRNGKey(0)
    k1, k2 = jax.random.split(key)
    # NCHW inputs, as a segmentation model would produce (probabilities / masks)
    y_pred = jax.nn.sigmoid(jax.random.normal(k1, (2, 4, 16, 16), jnp.float32))
    y_true = (jax.random.uniform(k2, (2, 4, 16, 16)) > 0.5).astype(jnp.float32)

    loss = jax.block_until_ready(dice_loss(y_pred, y_true))
    ref = jax.block_until_ready(_dice_loss_ref(y_pred, y_true))
    assert jnp.allclose(loss, ref, atol=1e-5, rtol=1e-5), (loss, ref)
    print("KERNEL_OK")
</pallas_src>

<mosaic_0001>
module attributes {stable_mosaic.version = 11 : i64} {
  func.func @_dice_kernel(%arg0: i32, %arg1: memref<16x128xf32, #tpu.memory_space<vmem>>, %arg2: memref<16x128xf32, #tpu.memory_space<vmem>>, %arg3: memref<1x1xf32, #tpu.memory_space<smem>>, %arg4: memref<2x128xf32, #tpu.memory_space<vmem>>) attributes {dimension_semantics = [#tpu.dimension_semantics<arbitrary>], iteration_bounds = array<i64: 1>, scalar_prefetch = 0 : i64, scratch_operands = 1 : i64, tpu.core_type = #tpu.core_type<tc>, window_params = [{transform_indices = @transform_0, window_bounds = array<i64: 16, 128>}, {transform_indices = @transform_1, window_bounds = array<i64: 16, 128>}, {transform_indices = @transform_2, window_bounds = array<i64: 1, 1>}]} {
    %c0_i32 = arith.constant 0 : i32
    %0 = arith.cmpi eq, %arg0, %c0_i32 : i32
    %1 = arith.extui %0 : i1 to i32
    %c0_i32_0 = arith.constant 0 : i32
    %2 = arith.cmpi ne, %1, %c0_i32_0 : i32
    scf.if %2 {
      %cst_14 = arith.constant 0.000000e+00 : f32
      %20 = vector.broadcast %cst_14 : f32 to vector<2x128xf32>
      %c0_15 = arith.constant 0 : index
      %c0_16 = arith.constant 0 : index
      %21 = vector.load %arg4[%c0_15, %c0_16] : memref<2x128xf32, #tpu.memory_space<vmem>>, vector<2x128xf32>
      tpu.vector_store %arg4[%c0_15, %c0_16], %20 {strides = array<i32>} : memref<2x128xf32, #tpu.memory_space<vmem>>, vector<2x128xf32>,
    } else {
    }
    %c0 = arith.constant 0 : index
    %c0_1 = arith.constant 0 : index
    %3 = vector.load %arg1[%c0, %c0_1] : memref<16x128xf32, #tpu.memory_space<vmem>>, vector<16x128xf32>
    %c0_2 = arith.constant 0 : index
    %c0_3 = arith.constant 0 : index
    %4 = vector.load %arg2[%c0_2, %c0_3] : memref<16x128xf32, #tpu.memory_space<vmem>>, vector<16x128xf32>
    %c0_4 = arith.constant 0 : index
    %c0_5 = arith.constant 0 : index
    %5 = vector.load %arg4[%c0_4, %c0_5] : memref<2x128xf32, #tpu.memory_space<vmem>>, vector<1x128xf32>
    %6 = arith.mulf %3, %4 : vector<16x128xf32>
    %cst = arith.constant dense<0.000000e+00> : vector<128xf32>
    %7 = vector.multi_reduction <add>, %6, %cst [0] : vector<16x128xf32> to vector<128xf32>
    %8 = vector.shape_cast %7 : vector<128xf32> to vector<1x128xf32>
    %9 = arith.addf %5, %8 : vector<1x128xf32>
    %c0_6 = arith.constant 0 : index
    %c0_7 = arith.constant 0 : index
    %10 = vector.load %arg4[%c0_6, %c0_7] : memref<2x128xf32, #tpu.memory_space<vmem>>, vector<1x128xf32>
    tpu.vector_store %arg4[%c0_6, %c0_7], %9 {strides = array<i32>} : memref<2x128xf32, #tpu.memory_space<vmem>>, vector<1x128xf32>,
    %c1 = arith.constant 1 : index
    %c0_8 = arith.constant 0 : index
    %11 = vector.load %arg4[%c1, %c0_8] : memref<2x128xf32, #tpu.memory_space<vmem>>, vector<1x128xf32>
    %12 = arith.addf %3, %4 : vector<16x128xf32>
    %cst_9 = arith.constant dense<0.000000e+00> : vector<128xf32>
    %13 = vector.multi_reduction <add>, %12, %cst_9 [0] : vector<16x128xf32> to vector<128xf32>
    %14 = vector.shape_cast %13 : vector<128xf32> to vector<1x128xf32>
    %15 = arith.addf %11, %14 : vector<1x128xf32>
    %c1_10 = arith.constant 1 : index
    %c0_11 = arith.constant 0 : index
    %16 = vector.load %arg4[%c1_10, %c0_11] : memref<2x128xf32, #tpu.memory_space<vmem>>, vector<1x128xf32>
    tpu.vector_store %arg4[%c1_10, %c0_11], %15 {strides = array<i32>} : memref<2x128xf32, #tpu.memory_space<vmem>>, vector<1x128xf32>,
    %c0_i32_12 = arith.constant 0 : i32
    %17 = arith.cmpi eq, %arg0, %c0_i32_12 : i32
    %18 = arith.extui %17 : i1 to i32
    %c0_i32_13 = arith.constant 0 : i32
    %19 = arith.cmpi ne, %18, %c0_i32_13 : i32
    scf.if %19 {
      %c0_14 = arith.constant 0 : index
      %c0_15 = arith.constant 0 : index
      %20 = vector.load %arg4[%c0_14, %c0_15] : memref<2x128xf32, #tpu.memory_space<vmem>>, vector<1x128xf32>
      %21 = vector.shape_cast %20 : vector<1x128xf32> to vector<1x1x128xf32>
      %cst_16 = arith.constant dense<0.000000e+00> : vector<1xf32>
      %22 = vector.multi_reduction <add>, %21, %cst_16 [1, 2] : vector<1x1x128xf32> to vector<1xf32>
      %23 = vector.shape_cast %22 : vector<1xf32> to vector<1x1x1xf32>
      %24 = vector.extract %23[0, 0, 0] : f32 from vector<1x1x1xf32>
      %c1_17 = arith.constant 1 : index
      %c0_18 = arith.constant 0 : index
      %25 = vector.load %arg4[%c1_17, %c0_18] : memref<2x128xf32, #tpu.memory_space<vmem>>, vector<1x128xf32>
      %26 = vector.shape_cast %25 : vector<1x128xf32> to vector<1x1x128xf32>
      %cst_19 = arith.constant dense<0.000000e+00> : vector<1xf32>
      %27 = vector.multi_reduction <add>, %26, %cst_19 [1, 2] : vector<1x1x128xf32> to vector<1xf32>
      %28 = vector.shape_cast %27 : vector<1xf32> to vector<1x1x1xf32>
      %29 = vector.extract %28[0, 0, 0] : f32 from vector<1x1x1xf32>
      %cst_20 = arith.constant 2.000000e+00 : f32
      %30 = arith.mulf %cst_20, %24 : f32
      %cst_21 = arith.constant 1.000000e+00 : f32
      %31 = arith.addf %30, %cst_21 : f32
      %cst_22 = arith.constant 1.000000e+00 : f32
      %32 = arith.addf %29, %cst_22 : f32
      %33 = arith.divf %31, %32 : f32
      %cst_23 = arith.constant 1.000000e+00 : f32
      %34 = arith.subf %cst_23, %33 : f32
      %c0_24 = arith.constant 0 : index
      %c0_25 = arith.constant 0 : index
      %35 = memref.load %arg3[%c0_24, %c0_25] : memref<1x1xf32, #tpu.memory_space<smem>>
      memref.store %34, %arg3[%c0_24, %c0_25] : memref<1x1xf32, #tpu.memory_space<smem>>
    } else {
    }
    return
  }
  func.func @transform_0(%arg0: i32) -> (i32, i32) {
    %c0_i32 = arith.constant 0 : i32
    %c0_i32_0 = arith.constant 0 : i32
    return %arg0, %c0_i32 : i32, i32
  }
  func.func @transform_1(%arg0: i32) -> (i32, i32) {
    %c0_i32 = arith.constant 0 : i32
    %c0_i32_0 = arith.constant 0 : i32
    return %arg0, %c0_i32 : i32, i32
  }
  func.func @transform_2(%arg0: i32) -> (i32, i32) {
    %c0_i32 = arith.constant 0 : i32
    %c0_i32_0 = arith.constant 0 : i32
    %c0_i32_1 = arith.constant 0 : i32
    return %c0_i32, %c0_i32_0 : i32, i32
  }
}

</mosaic_0001>

<bundles_post_ra>
// kernel: tpu_custom_call.1
= control target key start
LH: loop header
LB: loop body
LE: loop exit
PB: predicated region body
PF: predicated region fallthrough
CT: control target
= control target key end

     0   :  { %7 = vsyncpa [#allocation4], 0  ;;  %s255_s0 = inlined_call_operand.hbm [shape: f32[16,128], index: 0, kind: input, shape index: {}]   ;;  %s256_s1 = inlined_call_operand.hbm [shape: f32[16,128], index: 1, kind: input, shape index: {}]   ;;  %s257_s2 = inlined_call_operand.hbm [shape: f32[1,1], index: 2, kind: output, shape index: {}]  }
   0x1   :  { %8 = vsyncpa [#allocation7], 0 }
   0x2   :  { %9 = vsyncpa [#allocation5], 0  ;;  %s198_s9 = smov [#allocation3]   ;;  %s138_s13 = scalar_lea.hbm %s255_s0, 256 }
   0x3   :  { %s15_s10 = sshll.u32 %s198_s9, 4  ;;  %p139_p0 = scmp.ne.s32.totalorder %s255_s0, %s138_s13  ;;  %s16_s10 = int_to_ptr.vmem [resolvable:$true] %s15_s10 }
   0x4   :  { %p142_p1 = scmp.lt.u32.totalorder %s138_s13, %s255_s0 }
   0x6   :  { %p144_p2 = pnand %p142_p1, %p139_p0 }
   0x8   :  { %147 = shalt.err (!%p144_p2)
}
   0x9   :  { %s148_s18 = scalar_lea.vmem %s16_s10, 256  ;;  %p153_p4 = scmp.lt.s32.totalorder %s16_s10, %s16_s10 }
   0xa   :  { %p149_p3 = scmp.ne.s32.totalorder %s16_s10, %s148_s18  ;;  %p154_p5 = scmp.lt.s32.totalorder %s148_s18, %s148_s18 }
   0xc   :  { %p155_p6 = por %p154_p5, %p153_p4 }
   0xe   :  { %p156_p7 = pnand %p155_p6, %p149_p3 }
  0x10   :  { %159 = shalt.err (!%p156_p7)
}
  0x11   :  { %s199_s19 = smov 128   ;;  %s200_s20 = smov 8  }
  0x12   :  { %21 = dma.hbm_to_vmem [thread:$0]  %s255_s0, 256, %s16_s10, [#allocation4], %s199_s19, %s199_s19, %s200_s20  }
  0x13   :  { %s201_s23 = smov [#allocation6]   ;;  %s160_s27 = scalar_lea.hbm %s256_s1, 256 }
  0x14   :  { %s27_s24 = sshll.u32 %s201_s23, 4  ;;  %p161_p8 = scmp.ne.s32.totalorder %s256_s1, %s160_s27  ;;  %s28_s24 = int_to_ptr.vmem [resolvable:$true] %s27_s24 }
  0x15   :  { %p164_p9 = scmp.lt.u32.totalorder %s160_s27, %s256_s1 }
  0x17   :  { %p166_p10 = pnand %p164_p9, %p161_p8 }
  0x19   :  { %169 = shalt.err (!%p166_p10)
}
  0x1a   :  { %s170_s4 = scalar_lea.vmem %s28_s24, 256  ;;  %p175_p12 = scmp.lt.s32.totalorder %s28_s24, %s28_s24 }
  0x1b   :  { %p171_p11 = scmp.ne.s32.totalorder %s28_s24, %s170_s4  ;;  %p176_p13 = scmp.lt.s32.totalorder %s170_s4, %s170_s4 }
  0x1d   :  { %p177_p0 = por %p176_p13, %p175_p12 }
  0x1f   :  { %p178_p1 = pnand %p177_p0, %p171_p11 }
  0x21   :  { %181 = shalt.err (!%p178_p1)
}
  0x22   :  { %33 = dma.hbm_to_vmem [thread:$0]  %s256_s1, 256, %s28_s24, [#allocation7], %s199_s19, %s199_s19, %s200_s20  }
  0x23   :  { %192 = dma.done.wait [#allocation4], 256  }
  0x24   :  { %193 = vsyncadd [#allocation4], 4294967040 }
  0x25   :  { %194 = dma.done.wait [#allocation7], 256  }
  0x26   :  { %195 = vsyncadd [#allocation7], 4294967040  ;;  %v202_v0 = vmov 0.0   ;;  %v45_v1 = vld [vmem:[#allocation3] sm:$0xff]  ;;  %v46_v2 = vld [vmem:[#allocation3 + $0x8] sm:$0xff]  ;;  %vm77_vm0 = vcmask 1040384  }
  0x27   :  { %44 = vst [vmem:[#allocation2] sm:$0x3] %v202_v0  ;;  %v47_v3 = vld [vmem:[#allocation6] sm:$0xff]  ;;  %v48_v4 = vld [vmem:[#allocation6 + $0x8] sm:$0xff]  ;;  %s182_s15 = scalar_lea.hbm %s257_s2, 16 }
  0x28   :  { %v50_v5 = vmul.f32 %v47_v3, %v45_v1  ;;  %v62_v6 = vadd.f32 %v47_v3, %v45_v1  ;;  %v51_v7 = vmul.f32 %v48_v4, %v46_v2  ;;  %v63_v8 = vadd.f32 %v48_v4, %v46_v2  ;;  %p183_p2 = scmp.ne.s32.totalorder %s257_s2, %s182_s15  ;;  %p186_p3 = scmp.lt.u32.totalorder %s182_s15, %s257_s2 }
  0x2a   :  { %v52_v9 = vadd.f32 %v51_v7, %v50_v5  ;;  %v64_v10 = vadd.f32 %v63_v8, %v62_v6  ;;  %p188_p4 = pnand %p186_p3, %p183_p2 }
  0x2c   :  { %v53_v11 = vrot.slane %v52_v9, 4  ;;  %v65_v12 = vrot.slane %v64_v10, 4 }
  0x2e   :  { %v54_v13 = vadd.f32 %v53_v11, %v52_v9  ;;  %v66_v14 = vadd.f32 %v65_v12, %v64_v10  ;;  %v49_v21 = vld [vmem:[#allocation2] sm:$0x1]  ;;  %v61_v22 = vld [vmem:[#allocation2 + $0x1] sm:$0x1] }
  0x30   :  { %v55_v15 = vrot.slane %v54_v13, 2  ;;  %v67_v16 = vrot.slane %v66_v14, 2 }
  0x32   :  { %v56_v17 = vadd.f32 %v55_v15, %v54_v13  ;;  %v68_v18 = vadd.f32 %v67_v16, %v66_v14 }
  0x34   :  { %v57_v19 = vrot.slane %v56_v17, 1  ;;  %v69_v20 = vrot.slane %v68_v18, 1 }
  0x36   :  { %v58_v23 = vadd.f32 %v57_v19, %v56_v17  ;;  %v70_v24 = vadd.f32 %v69_v20, %v68_v18 }
  0x38   :  { %v59_v25 = vadd.f32 %v58_v23, %v49_v21  ;;  %v71_v26 = vadd.f32 %v70_v24, %v61_v22 }
  0x3a   :  { %60 = vst [vmem:[#allocation2] sm:$0x1] %v59_v25  ;;  %72 = vst [vmem:[#allocation2 + $0x1] sm:$0x1] %v71_v26 }
  0x41   :  { %v76_v27 = vld [vmem:[#allocation2] sm:$0x1]  ;;  %v88_v28 = vld [vmem:[#allocation2 + $0x1] sm:$0x1] }
  0x42   :  { %v78_v29 = vsel %vm77_vm0, %v76_v27, 0.0  ;;  %v89_v30 = vsel %vm77_vm0, %v88_v28, 0.0 }
  0x43   :  { %79 = vadd.xlane.f32.xlu0 %v78_v29 }
  0x47   :  { %90 = vadd.xlane.f32.xlu0 %v89_v30 }
  0xd0   :  { %v80_v31 = vpop.xlane.xlu0 %79 }
  0xd1   :  { %v81_v32 = vrot.slane %v80_v31, 4 }
  0xd3   :  { %v82_v33 = vadd.f32 %v81_v32, %v80_v31 }
  0xd4   :  { %v91_v34 = vpop.xlane.xlu0 %90 }
  0xd5   :  { %v83_v35 = vrot.slane %v82_v33, 2  ;;  %v92_v36 = vrot.slane %v91_v34, 4 }
  0xd7   :  { %v93_v37 = vadd.f32 %v92_v36, %v91_v34  ;;  %v84_v38 = vadd.f32 %v83_v35, %v82_v33 }
  0xd9   :  { %v94_v39 = vrot.slane %v93_v37, 2  ;;  %v85_v40 = vrot.slane %v84_v38, 1 }
  0xdb   :  { %v95_v41 = vadd.f32 %v94_v39, %v93_v37  ;;  %v86_v42 = vadd.f32 %v85_v40, %v84_v38 }
  0xdd   :  { %124 = vpush %v86_v42  ;;  %v96_v43 = vrot.slane %v95_v41, 1 }
  0xdf   :  { %v97_v44 = vadd.f32 %v96_v43, %v95_v41 }
  0xe1   :  { %126 = vpush %v97_v44 }
 0x10e   :  { %s125_s1 = spop %124 }
 0x10f   :  { %s99_s8 = smul.f32 2.0, %s125_s1 }
 0x111   :  { %s100_s9 = sadd.f32 1.0, %s99_s8 }
 0x112   :  { %s127_s6 = spop %126 }
 0x113   :  { %s101_s7 = sadd.f32 1.0, %s127_s6 }
 0x115   :  { %v102_v45 = vstv %s101_s7 }
 0x116   :  { %136 = vrcp.f32 %v102_v45 }
 0x120   :  { %v137_v46 = vpop.eup %136 }
 0x121   :  { %128 = vpush %v137_v46 }
 0x152   :  { %s129_s10 = spop %128 }
 0x153   :  { %s105_s11 = smul.f32 %s129_s10, %s100_s9 }
 0x155   :  { %s106_s12 = ssub.f32 1.0, %s105_s11 }
 0x157   :  { %108 = sst [smem:[#allocation8]] %s106_s12 }
 0x158   :  { %191 = shalt.err (!%p188_p4)
}
 0x159   :  { %s203_s20 = smov [#allocation8]  }
 0x15a   :  { %116 = dma.smem_to_hbm %s203_s20, 16, %s257_s2, [#allocation5]  }
 0x15b   :  { %196 = dma.done.wait [#allocation5], 16  }
 0x15c   :  { %197 = vsyncadd [#allocation5], 4294967280 }
 0x15d   :  { %120 = sfence }
 0x15e   :  { %121 = vsyncpa [#allocation4], 1 }
 0x15f   :  { %122 = vsyncpa [#allocation7], 1 }
 0x160   :  { %123 = vsyncpa [#allocation5], 1 }

</bundles_post_ra>
